<compile_context>
chip_gen: v7x
topology: tpu7x:2x2x1
jax: 0.10.0
libtpu: 0.0.40
codegen_flags: <defaults>
</compile_context>

<pallas_src>
import math

import jax
import jax.numpy as jnp
from jax.experimental import pallas as pl
from jax.experimental.pallas import tpu as pltpu


# ---------------------------------------------------------------------------
# Host-side constant builders (glue / parameter setup)
# ---------------------------------------------------------------------------
def _dht_matrices(n):
    """Return (C+S, C-S, C, S) with C[k,m]=cos(2*pi*k*m/n), S[k,m]=sin(2*pi*k*m/n)."""
    k = jnp.arange(n, dtype=jnp.float32)
    theta = 2.0 * jnp.pi * jnp.outer(k, k) / float(n)
    c = jnp.cos(theta)
    s = jnp.sin(theta)
    return c + s, c - s, c, s


def _crop_indices(full, out):
    """Row/col indices kept by PyTorch's _spectral_crop along one dimension."""
    c = math.ceil(out / 2)
    if out % 2 == 1:
        idx = list(range(c)) + list(range(full - (c - 1), full))
    else:
        idx = list(range(c)) + list(range(full - c, full))
    return jnp.asarray(idx, dtype=jnp.int32)


def _selection_matrix(idx, full):
    out = int(idx.shape[0])
    m = jnp.zeros((out, full), dtype=jnp.float32)
    return m.at[jnp.arange(out), idx].set(1.0)


# ---------------------------------------------------------------------------
# Kernel A: fused spectral pooling + 2x2/stride-2 max pooling.
# One grid step = one (batch, channel-tile) pair; all matmuls in bf16.
# ---------------------------------------------------------------------------
def _pool_kernel(x_ref, rcat_ref, lmats_ref, colsel_ref, spec_ref, max_ref, rt_ref):
    # x_ref:      (TC*H, W)    f32  one channel-tile of one batch element
    # rcat_ref:   (W, 4*ow)    bf16 folded spectral right factors [B1|B2|B3|B4]
    # lmats_ref:  (4, oh, H)   bf16 folded spectral left factors  [A1..A4]
    # colsel_ref: (W, 2*ow)    bf16 max-pool even/odd column selectors
    # spec_ref:   (TC, oh, ow) bf16 spectral-pool output (channel-major)
    # max_ref:    (TC, oh, ow) bf16 max-pool output (channel-major)
    # rt_ref:     (H, 4*TC*ow) bf16 scratch: r relayouted factor-major, then channel
    TC, oh, ow = spec_ref.shape
    TCH, W = x_ref.shape
    H = TCH // TC

    # ---- spectral stage 1: every W-contraction for every channel in ONE matmul
    xb = x_ref[...].astype(jnp.bfloat16)                            # (TC*H, W)
    r = jnp.dot(xb, rcat_ref[...],
                preferred_element_type=jnp.float32)                 # (TC*H, 4*ow)
    rb = r.astype(jnp.bfloat16)

    # ---- relayout r -> (H, [factor, channel, ow]) via static lane-offset stores
    for i in range(4):
        for c in range(TC):
            rt_ref[:, (i * TC + c) * ow:(i * TC + c + 1) * ow] = (
                rb[c * H:(c + 1) * H, i * ow:(i + 1) * ow])

    # ---- spectral stage 2: one wide (oh, H) @ (H, TC*ow) matmul per factor
    spec_t = jnp.zeros((oh, TC * ow), jnp.float32)
    for i in range(4):
        spec_t = spec_t + jnp.dot(
            lmats_ref[i], rt_ref[:, i * TC * ow:(i + 1) * TC * ow],
            preferred_element_type=jnp.float32)                     # (oh, TC*ow)

    # ---- 2x2/stride-2 max pool: VPU row-pair max + bf16 column-compaction matmul
    xe = x_ref[pl.ds(0, TC * oh, stride=2), :]                      # rows with h even
    xo = x_ref[pl.ds(1, TC * oh, stride=2), :]                      # rows with h odd
    rowmax = jnp.maximum(xe, xo).astype(jnp.bfloat16)               # (TC*oh, W)
    cc = jnp.dot(rowmax, colsel_ref[...],
                 preferred_element_type=jnp.float32)                # (TC*oh, 2*ow)
    mp = jnp.maximum(cc[:, :ow], cc[:, ow:])                        # (TC*oh, ow)

    # ---- channel-major stores (static slices; narrow lanes only at tiny shapes)
    for c in range(TC):
        spec_ref[c] = spec_t[:, c * ow:(c + 1) * ow].astype(jnp.bfloat16)
        max_ref[c] = mp[c * oh:(c + 1) * oh, :].astype(jnp.bfloat16)


# ---------------------------------------------------------------------------
# Kernel B: 1x1 conv, gridded over (batch, spatial tile); writes final layout.
# ---------------------------------------------------------------------------
def _conv1x1_kernel(spec_ref, max_ref, wspec_ref, wmax_ref, bias_ref, o_ref):
    # spec_ref/max_ref: (C, TS) bf16 channel-major tiles of one batch element
    # wspec/wmax:       (C, C)  bf16 conv weight halves ; bias: (C, 1) f32
    # o_ref:            (C, TS) f32  final output tile (already (B, C, oh*ow) layout)
    o_ref[...] = (jnp.dot(wspec_ref[...], spec_ref[...],
                          preferred_element_type=jnp.float32)
                  + jnp.dot(wmax_ref[...], max_ref[...],
                            preferred_element_type=jnp.float32)
                  + bias_ref[...])


# ---------------------------------------------------------------------------
# Wrapper
# ---------------------------------------------------------------------------
def hybrid_pooling(x, weight, bias, pool_size):
    """x: (B, C, H, W) f32; weight: (C, 2C); bias: (C,); pool_size: (oh, ow)."""
    B, C, H, W = x.shape
    oh, ow = int(pool_size[0]), int(pool_size[1])
    assert H % 2 == 0 and W % 2 == 0 and oh == H // 2 and ow == W // 2, \
        "pool_size must match the 2x2/stride-2 max-pool output for channel concat"
    assert H % 8 == 0, "channel blocks must stay sublane-aligned"

    TC = C if C <= 16 else 16                 # channel tile (bounds VMEM & unroll)
    assert C % TC == 0                        # TODO(synk): pad C for non-multiples

    # ---- folded spectral constants: spec = sum_i A_i @ (X @ B_i) ----
    pH, qH, _, _ = _dht_matrices(H)           # (C+S)_H, (C-S)_H
    _, _, cW, sW = _dht_matrices(W)           # C_W, S_W
    p2, q2, _, _ = _dht_matrices(oh)
    _, _, c2, s2 = _dht_matrices(ow)
    rH = _selection_matrix(_crop_indices(H, oh), H)       # (oh, H)
    rW = _selection_matrix(_crop_indices(W, ow), W)       # (ow, W)

    a1 = p2 @ rH @ pH
    a2 = p2 @ rH @ qH
    a3 = q2 @ rH @ pH
    a4 = q2 @ rH @ qH                                     # (oh, H) each
    b1 = cW @ rW.T @ c2
    b2 = sW @ rW.T @ c2
    b3 = cW @ rW.T @ s2
    b4 = sW @ rW.T @ s2                                   # (W, ow) each

    rcat = jnp.concatenate([b1, b2, b3, b4], axis=1).astype(jnp.bfloat16)   # (W, 4*ow)
    lmats = jnp.stack([a1, a2, a3, a4], axis=0).astype(jnp.bfloat16)        # (4, oh, H)

    # ---- max-pool even/odd column selectors (compaction only; rows use VPU max)
    sel_e = _selection_matrix(jnp.arange(0, W, 2, dtype=jnp.int32), W).T    # (W, ow)
    sel_o = _selection_matrix(jnp.arange(1, W, 2, dtype=jnp.int32), W).T
    colsel = jnp.concatenate([sel_e, sel_o], axis=1).astype(jnp.bfloat16)   # (W, 2*ow)

    x2d = x.astype(jnp.float32).reshape(B, C * H, W)      # free metadata reshape

    # ---- kernel A: fused spectral + max pool, grid over (batch, channel tile)
    spec_cm, max_cm = pl.pallas_call(
        _pool_kernel,
        out_shape=(jax.ShapeDtypeStruct((B, C, oh, ow), jnp.bfloat16),
                   jax.ShapeDtypeStruct((B, C, oh, ow), jnp.bfloat16)),
        grid=(B, C // TC),
        in_specs=[pl.BlockSpec((None, TC * H, W), lambda b, ct: (b, ct, 0)),
                  pl.BlockSpec((W, 4 * ow), lambda b, ct: (0, 0)),
                  pl.BlockSpec((4, oh, H), lambda b, ct: (0, 0, 0)),
                  pl.BlockSpec((W, 2 * ow), lambda b, ct: (0, 0))],
        out_specs=(pl.BlockSpec((None, TC, oh, ow), lambda b, ct: (b, ct, 0, 0)),
                   pl.BlockSpec((None, TC, oh, ow), lambda b, ct: (b, ct, 0, 0))),
        scratch_shapes=[pltpu.VMEM((H, 4 * TC * ow), jnp.bfloat16)],
        compiler_params=pltpu.CompilerParams(
            dimension_semantics=("parallel", "parallel"),
            vmem_limit_bytes=64 * 1024 * 1024),
    )(x2d, rcat, lmats, colsel)

    # ---- kernel B: 1x1 conv over the two channel-major halves, final layout ----
    SP = oh * ow
    TS = SP if SP <= 2048 else 2048           # fixed lane-dense spatial tile
    nT = pl.cdiv(SP, TS)

    spec3 = spec_cm.reshape(B, C, SP)         # free reshapes (contiguous)
    max3 = max_cm.reshape(B, C, SP)
    wspec = weight[:, :C].astype(jnp.bfloat16)
    wmax = weight[:, C:].astype(jnp.bfloat16)
    bias2 = bias.reshape(C, 1).astype(jnp.float32)

    out3 = pl.pallas_call(
        _conv1x1_kernel,
        out_shape=jax.ShapeDtypeStruct((B, C, SP), jnp.float32),
        grid=(B, nT),
        in_specs=[pl.BlockSpec((None, C, TS), lambda b, t: (b, 0, t)),
                  pl.BlockSpec((None, C, TS), lambda b, t: (b, 0, t)),
                  pl.BlockSpec((C, C), lambda b, t: (0, 0)),
                  pl.BlockSpec((C, C), lambda b, t: (0, 0)),
                  pl.BlockSpec((C, 1), lambda b, t: (0, 0))],
        out_specs=pl.BlockSpec((None, C, TS), lambda b, t: (b, 0, t)),
        compiler_params=pltpu.CompilerParams(
            dimension_semantics=("parallel", "parallel"),
            vmem_limit_bytes=64 * 1024 * 1024),
    )(spec3, max3, wspec, wmax, bias2)

    return out3.reshape(B, C, oh, ow)         # free reshape, already (B, C, ...) order


# ---------------------------------------------------------------------------
# Pure-JAX reference (mirrors the PyTorch forward) for validation
# ---------------------------------------------------------------------------
def _reference(x, weight, bias, pool_size):
    oh, ow = pool_size

    def dht(a):
        f = jnp.fft.fft2(a)
        return f.real - f.imag

    d = dht(x)
    hi = _crop_indices(x.shape[2], oh)
    wi = _crop_indices(x.shape[3], ow)
    cropped = d[:, :, hi, :][:, :, :, wi]
    spec = dht(cropped)
    mp = jax.lax.reduce_window(x, -jnp.inf, jax.lax.max,
                               (1, 1, 2, 2), (1, 1, 2, 2), "VALID")
    cat = jnp.concatenate([spec, mp], axis=1)
    return jnp.einsum("oc,bchw->bohw", weight, cat) + bias[None, :, None, None]


if __name__ == "__main__":
    B, C, H, W = 2, 4, 16, 16
    pool_size = (H // 2, W // 2)

    key = jax.random.PRNGKey(0)
    kx, kw, kb = jax.random.split(key, 3)
    x = jax.random.normal(kx, (B, C, H, W), dtype=jnp.float32)
    # conv_k1: nn.Conv2d(2C, C, kernel_size=1) -> weight (C, 2C, 1, 1), bias (C,)
    weight = 0.1 * jax.random.normal(kw, (C, 2 * C), dtype=jnp.float32)
    bias = 0.1 * jax.random.normal(kb, (C,), dtype=jnp.float32)

    out = hybrid_pooling(x, weight, bias, pool_size)
    out = jax.block_until_ready(out)

    ref = jax.block_until_ready(_reference(x, weight, bias, pool_size))
    err = float(jnp.max(jnp.abs(out - ref)) / (jnp.max(jnp.abs(ref)) + 1e-6))
    assert out.shape == (B, C, H // 2, W // 2), out.shape
    assert err < 5e-2, f"mismatch vs reference: rel err {err}"

    print("KERNEL_OK")
</pallas_src>

<mosaic_0001>
module attributes {stable_mosaic.version = 11 : i64} {
  func.func @_pool_kernel(%arg0: i32, %arg1: i32, %arg2: memref<1x64x16xf32, #tpu.memory_space<vmem>>, %arg3: memref<16x32xbf16, #tpu.memory_space<vmem>>, %arg4: memref<4x8x16xbf16, #tpu.memory_space<vmem>>, %arg5: memref<16x16xbf16, #tpu.memory_space<vmem>>, %arg6: memref<1x4x8x8xbf16, #tpu.memory_space<vmem>>, %arg7: memref<1x4x8x8xbf16, #tpu.memory_space<vmem>>, %arg8: memref<16x128xbf16, #tpu.memory_space<vmem>>) attributes {dimension_semantics = [#tpu.dimension_semantics<parallel>, #tpu.dimension_semantics<parallel>], iteration_bounds = array<i64: 2, 1>, scalar_prefetch = 0 : i64, scratch_operands = 1 : i64, tpu.core_type = #tpu.core_type<tc>, window_params = [{transform_indices = @transform_0, window_bounds = array<i64: 1, 64, 16>}, {pipeline_mode = #tpu.pipeline_mode<synchronous>, transform_indices = @transform_1, window_bounds = array<i64: 16, 32>}, {pipeline_mode = #tpu.pipeline_mode<synchronous>, transform_indices = @transform_2, window_bounds = array<i64: 4, 8, 16>}, {pipeline_mode = #tpu.pipeline_mode<synchronous>, transform_indices = @transform_3, window_bounds = array<i64: 16, 16>}, {transform_indices = @transform_4, window_bounds = array<i64: 1, 4, 8, 8>}, {transform_indices = @transform_5, window_bounds = array<i64: 1, 4, 8, 8>}]} {
    %c0 = arith.constant 0 : index
    %c0_0 = arith.constant 0 : index
    %c0_1 = arith.constant 0 : index
    %0 = vector.load %arg2[%c0, %c0_0, %c0_1] : memref<1x64x16xf32, #tpu.memory_space<vmem>>, vector<1x64x16xf32>
    %1 = vector.shape_cast %0 : vector<1x64x16xf32> to vector<64x16xf32>
    %2 = arith.truncf %1 : vector<64x16xf32> to vector<64x16xbf16>
    %c0_2 = arith.constant 0 : index
    %c0_3 = arith.constant 0 : index
    %3 = vector.load %arg3[%c0_2, %c0_3] : memref<16x32xbf16, #tpu.memory_space<vmem>>, vector<16x32xbf16>
    %cst = arith.constant dense<0.000000e+00> : vector<64x32xf32>
    %4 = tpu.matmul %2, %3, %cst {dimension_numbers = #tpu.dot_dimension_numbers<[1], [0], [0], [1], [0, 0, 1, 1], [], []>} : vector<64x16xbf16>, vector<16x32xbf16>, vector<64x32xf32> -> vector<64x32xf32>
    %5 = arith.truncf %4 : vector<64x32xf32> to vector<64x32xbf16>
    %6 = vector.extract_strided_slice %5 {offsets = [0, 0], sizes = [16, 8], strides = [1, 1]} : vector<64x32xbf16> to vector<16x8xbf16>
    %c0_4 = arith.constant 0 : index
    %c0_5 = arith.constant 0 : index
    %7 = vector.load %arg8[%c0_4, %c0_5] : memref<16x128xbf16, #tpu.memory_space<vmem>>, vector<16x8xbf16>
    tpu.vector_store %arg8[%c0_4, %c0_5], %6 {strides = array<i32>} : memref<16x128xbf16, #tpu.memory_space<vmem>>, vector<16x8xbf16>,
    %8 = vector.extract_strided_slice %5 {offsets = [16, 0], sizes = [16, 8], strides = [1, 1]} : vector<64x32xbf16> to vector<16x8xbf16>
    %c0_6 = arith.constant 0 : index
    %c8 = arith.constant 8 : index
    %9 = vector.load %arg8[%c0_6, %c8] : memref<16x128xbf16, #tpu.memory_space<vmem>>, vector<16x8xbf16>
    tpu.vector_store %arg8[%c0_6, %c8], %8 {strides = array<i32>} : memref<16x128xbf16, #tpu.memory_space<vmem>>, vector<16x8xbf16>,
    %10 = vector.extract_strided_slice %5 {offsets = [32, 0], sizes = [16, 8], strides = [1, 1]} : vector<64x32xbf16> to vector<16x8xbf16>
    %c0_7 = arith.constant 0 : index
    %c16 = arith.constant 16 : index
    %11 = vector.load %arg8[%c0_7, %c16] : memref<16x128xbf16, #tpu.memory_space<vmem>>, vector<16x8xbf16>
    tpu.vector_store %arg8[%c0_7, %c16], %10 {strides = array<i32>} : memref<16x128xbf16, #tpu.memory_space<vmem>>, vector<16x8xbf16>,
    %12 = vector.extract_strided_slice %5 {offsets = [48, 0], sizes = [16, 8], strides = [1, 1]} : vector<64x32xbf16> to vector<16x8xbf16>
    %c0_8 = arith.constant 0 : index
    %c24 = arith.constant 24 : index
    %13 = vector.load %arg8[%c0_8, %c24] : memref<16x128xbf16, #tpu.memory_space<vmem>>, vector<16x8xbf16>
    tpu.vector_store %arg8[%c0_8, %c24], %12 {strides = array<i32>} : memref<16x128xbf16, #tpu.memory_space<vmem>>, vector<16x8xbf16>,
    %14 = vector.extract_strided_slice %5 {offsets = [0, 8], sizes = [16, 8], strides = [1, 1]} : vector<64x32xbf16> to vector<16x8xbf16>
    %c0_9 = arith.constant 0 : index
    %c32 = arith.constant 32 : index
    %15 = vector.load %arg8[%c0_9, %c32] : memref<16x128xbf16, #tpu.memory_space<vmem>>, vector<16x8xbf16>
    tpu.vector_store %arg8[%c0_9, %c32], %14 {strides = array<i32>} : memref<16x128xbf16, #tpu.memory_space<vmem>>, vector<16x8xbf16>,
    %16 = vector.extract_strided_slice %5 {offsets = [16, 8], sizes = [16, 8], strides = [1, 1]} : vector<64x32xbf16> to vector<16x8xbf16>
    %c0_10 = arith.constant 0 : index
    %c40 = arith.constant 40 : index
    %17 = vector.load %arg8[%c0_10, %c40] : memref<16x128xbf16, #tpu.memory_space<vmem>>, vector<16x8xbf16>
    tpu.vector_store %arg8[%c0_10, %c40], %16 {strides = array<i32>} : memref<16x128xbf16, #tpu.memory_space<vmem>>, vector<16x8xbf16>,
    %18 = vector.extract_strided_slice %5 {offsets = [32, 8], sizes = [16, 8], strides = [1, 1]} : vector<64x32xbf16> to vector<16x8xbf16>
    %c0_11 = arith.constant 0 : index
    %c48 = arith.constant 48 : index
    %19 = vector.load %arg8[%c0_11, %c48] : memref<16x128xbf16, #tpu.memory_space<vmem>>, vector<16x8xbf16>
    tpu.vector_store %arg8[%c0_11, %c48], %18 {strides = array<i32>} : memref<16x128xbf16, #tpu.memory_space<vmem>>, vector<16x8xbf16>,
    %20 = vector.extract_strided_slice %5 {offsets = [48, 8], sizes = [16, 8], strides = [1, 1]} : vector<64x32xbf16> to vector<16x8xbf16>
    %c0_12 = arith.constant 0 : index
    %c56 = arith.constant 56 : index
    %21 = vector.load %arg8[%c0_12, %c56] : memref<16x128xbf16, #tpu.memory_space<vmem>>, vector<16x8xbf16>
    tpu.vector_store %arg8[%c0_12, %c56], %20 {strides = array<i32>} : memref<16x128xbf16, #tpu.memory_space<vmem>>, vector<16x8xbf16>,
    %22 = vector.extract_strided_slice %5 {offsets = [0, 16], sizes = [16, 8], strides = [1, 1]} : vector<64x32xbf16> to vector<16x8xbf16>
    %c0_13 = arith.constant 0 : index
    %c64 = arith.constant 64 : index
    %23 = vector.load %arg8[%c0_13, %c64] : memref<16x128xbf16, #tpu.memory_space<vmem>>, vector<16x8xbf16>
    tpu.vector_store %arg8[%c0_13, %c64], %22 {strides = array<i32>} : memref<16x128xbf16, #tpu.memory_space<vmem>>, vector<16x8xbf16>,
    %24 = vector.extract_strided_slice %5 {offsets = [16, 16], sizes = [16, 8], strides = [1, 1]} : vector<64x32xbf16> to vector<16x8xbf16>
    %c0_14 = arith.constant 0 : index
    %c72 = arith.constant 72 : index
    %25 = vector.load %arg8[%c0_14, %c72] : memref<16x128xbf16, #tpu.memory_space<vmem>>, vector<16x8xbf16>
    tpu.vector_store %arg8[%c0_14, %c72], %24 {strides = array<i32>} : memref<16x128xbf16, #tpu.memory_space<vmem>>, vector<16x8xbf16>,
    %26 = vector.extract_strided_slice %5 {offsets = [32, 16], sizes = [16, 8], strides = [1, 1]} : vector<64x32xbf16> to vector<16x8xbf16>
    %c0_15 = arith.constant 0 : index
    %c80 = arith.constant 80 : index
    %27 = vector.load %arg8[%c0_15, %c80] : memref<16x128xbf16, #tpu.memory_space<vmem>>, vector<16x8xbf16>
    tpu.vector_store %arg8[%c0_15, %c80], %26 {strides = array<i32>} : memref<16x128xbf16, #tpu.memory_space<vmem>>, vector<16x8xbf16>,
    %28 = vector.extract_strided_slice %5 {offsets = [48, 16], sizes = [16, 8], strides = [1, 1]} : vector<64x32xbf16> to vector<16x8xbf16>
    %c0_16 = arith.constant 0 : index
    %c88 = arith.constant 88 : index
    %29 = vector.load %arg8[%c0_16, %c88] : memref<16x128xbf16, #tpu.memory_space<vmem>>, vector<16x8xbf16>
    tpu.vector_store %arg8[%c0_16, %c88], %28 {strides = array<i32>} : memref<16x128xbf16, #tpu.memory_space<vmem>>, vector<16x8xbf16>,
    %30 = vector.extract_strided_slice %5 {offsets = [0, 24], sizes = [16, 8], strides = [1, 1]} : vector<64x32xbf16> to vector<16x8xbf16>
    %c0_17 = arith.constant 0 : index
    %c96 = arith.constant 96 : index
    %31 = vector.load %arg8[%c0_17, %c96] : memref<16x128xbf16, #tpu.memory_space<vmem>>, vector<16x8xbf16>
    tpu.vector_store %arg8[%c0_17, %c96], %30 {strides = array<i32>} : memref<16x128xbf16, #tpu.memory_space<vmem>>, vector<16x8xbf16>,
    %32 = vector.extract_strided_slice %5 {offsets = [16, 24], sizes = [16, 8], strides = [1, 1]} : vector<64x32xbf16> to vector<16x8xbf16>
    %c0_18 = arith.constant 0 : index
    %c104 = arith.constant 104 : index
    %33 = vector.load %arg8[%c0_18, %c104] : memref<16x128xbf16, #tpu.memory_space<vmem>>, vector<16x8xbf16>
    tpu.vector_store %arg8[%c0_18, %c104], %32 {strides = array<i32>} : memref<16x128xbf16, #tpu.memory_space<vmem>>, vector<16x8xbf16>,
    %34 = vector.extract_strided_slice %5 {offsets = [32, 24], sizes = [16, 8], strides = [1, 1]} : vector<64x32xbf16> to vector<16x8xbf16>
    %c0_19 = arith.constant 0 : index
    %c112 = arith.constant 112 : index
    %35 = vector.load %arg8[%c0_19, %c112] : memref<16x128xbf16, #tpu.memory_space<vmem>>, vector<16x8xbf16>
    tpu.vector_store %arg8[%c0_19, %c112], %34 {strides = array<i32>} : memref<16x128xbf16, #tpu.memory_space<vmem>>, vector<16x8xbf16>,
    %36 = vector.extract_strided_slice %5 {offsets = [48, 24], sizes = [16, 8], strides = [1, 1]} : vector<64x32xbf16> to vector<16x8xbf16>
    %c0_20 = arith.constant 0 : index
    %c120 = arith.constant 120 : index
    %37 = vector.load %arg8[%c0_20, %c120] : memref<16x128xbf16, #tpu.memory_space<vmem>>, vector<16x8xbf16>
    tpu.vector_store %arg8[%c0_20, %c120], %36 {strides = array<i32>} : memref<16x128xbf16, #tpu.memory_space<vmem>>, vector<16x8xbf16>,
    %cst_21 = arith.constant 0.000000e+00 : f32
    %38 = vector.broadcast %cst_21 : f32 to vector<8x32xf32>
    %c0_22 = arith.constant 0 : index
    %c0_23 = arith.constant 0 : index
    %c0_24 = arith.constant 0 : index
    %39 = vector.load %arg4[%c0_22, %c0_23, %c0_24] : memref<4x8x16xbf16, #tpu.memory_space<vmem>>, vector<1x8x16xbf16>
    %40 = vector.shape_cast %39 : vector<1x8x16xbf16> to vector<8x16xbf16>
    %c0_25 = arith.constant 0 : index
    %c0_26 = arith.constant 0 : index
    %41 = vector.load %arg8[%c0_25, %c0_26] : memref<16x128xbf16, #tpu.memory_space<vmem>>, vector<16x32xbf16>
    %cst_27 = arith.constant dense<0.000000e+00> : vector<8x32xf32>
    %42 = tpu.matmul %40, %41, %cst_27 {dimension_numbers = #tpu.dot_dimension_numbers<[1], [0], [0], [1], [0, 0, 1, 1], [], []>} : vector<8x16xbf16>, vector<16x32xbf16>, vector<8x32xf32> -> vector<8x32xf32>
    %43 = arith.addf %38, %42 : vector<8x32xf32>
    %c1 = arith.constant 1 : index
    %c0_28 = arith.constant 0 : index
    %c0_29 = arith.constant 0 : index
    %44 = vector.load %arg4[%c1, %c0_28, %c0_29] : memref<4x8x16xbf16, #tpu.memory_space<vmem>>, vector<1x8x16xbf16>
    %45 = vector.shape_cast %44 : vector<1x8x16xbf16> to vector<8x16xbf16>
    %c0_30 = arith.constant 0 : index
    %c32_31 = arith.constant 32 : index
    %46 = vector.load %arg8[%c0_30, %c32_31] : memref<16x128xbf16, #tpu.memory_space<vmem>>, vector<16x32xbf16>
    %cst_32 = arith.constant dense<0.000000e+00> : vector<8x32xf32>
    %47 = tpu.matmul %45, %46, %cst_32 {dimension_numbers = #tpu.dot_dimension_numbers<[1], [0], [0], [1], [0, 0, 1, 1], [], []>} : vector<8x16xbf16>, vector<16x32xbf16>, vector<8x32xf32> -> vector<8x32xf32>
    %48 = arith.addf %43, %47 : vector<8x32xf32>
    %c2 = arith.constant 2 : index
    %c0_33 = arith.constant 0 : index
    %c0_34 = arith.constant 0 : index
    %49 = vector.load %arg4[%c2, %c0_33, %c0_34] : memref<4x8x16xbf16, #tpu.memory_space<vmem>>, vector<1x8x16xbf16>
    %50 = vector.shape_cast %49 : vector<1x8x16xbf16> to vector<8x16xbf16>
    %c0_35 = arith.constant 0 : index
    %c64_36 = arith.constant 64 : index
    %51 = vector.load %arg8[%c0_35, %c64_36] : memref<16x128xbf16, #tpu.memory_space<vmem>>, vector<16x32xbf16>
    %cst_37 = arith.constant dense<0.000000e+00> : vector<8x32xf32>
    %52 = tpu.matmul %50, %51, %cst_37 {dimension_numbers = #tpu.dot_dimension_numbers<[1], [0], [0], [1], [0, 0, 1, 1], [], []>} : vector<8x16xbf16>, vector<16x32xbf16>, vector<8x32xf32> -> vector<8x32xf32>
    %53 = arith.addf %48, %52 : vector<8x32xf32>
    %c3 = arith.constant 3 : index
    %c0_38 = arith.constant 0 : index
    %c0_39 = arith.constant 0 : index
    %54 = vector.load %arg4[%c3, %c0_38, %c0_39] : memref<4x8x16xbf16, #tpu.memory_space<vmem>>, vector<1x8x16xbf16>
    %55 = vector.shape_cast %54 : vector<1x8x16xbf16> to vector<8x16xbf16>
    %c0_40 = arith.constant 0 : index
    %c96_41 = arith.constant 96 : index
    %56 = vector.load %arg8[%c0_40, %c96_41] : memref<16x128xbf16, #tpu.memory_space<vmem>>, vector<16x32xbf16>
    %cst_42 = arith.constant dense<0.000000e+00> : vector<8x32xf32>
    %57 = tpu.matmul %55, %56, %cst_42 {dimension_numbers = #tpu.dot_dimension_numbers<[1], [0], [0], [1], [0, 0, 1, 1], [], []>} : vector<8x16xbf16>, vector<16x32xbf16>, vector<8x32xf32> -> vector<8x32xf32>
    %58 = arith.addf %53, %57 : vector<8x32xf32>
    %c0_43 = arith.constant 0 : index
    %c0_44 = arith.constant 0 : index
    %c0_45 = arith.constant 0 : index
    %59 = tpu.strided_load %arg2[%c0_43, %c0_44, %c0_45] {strides = array<i32: 1, 2, 1>} : memref<1x64x16xf32, #tpu.memory_space<vmem>>, vector<1x32x16xf32>
    %60 = vector.shape_cast %59 : vector<1x32x16xf32> to vector<32x16xf32>
    %c0_46 = arith.constant 0 : index
    %c1_47 = arith.constant 1 : index
    %c0_48 = arith.constant 0 : index
    %61 = tpu.strided_load %arg2[%c0_46, %c1_47, %c0_48] {strides = array<i32: 1, 2, 1>} : memref<1x64x16xf32, #tpu.memory_space<vmem>>, vector<1x32x16xf32>
    %62 = vector.shape_cast %61 : vector<1x32x16xf32> to vector<32x16xf32>
    %63 = arith.maximumf %60, %62 : vector<32x16xf32>
    %64 = arith.truncf %63 : vector<32x16xf32> to vector<32x16xbf16>
    %c0_49 = arith.constant 0 : index
    %c0_50 = arith.constant 0 : index
    %65 = vector.load %arg5[%c0_49, %c0_50] : memref<16x16xbf16, #tpu.memory_space<vmem>>, vector<16x16xbf16>
    %cst_51 = arith.constant dense<0.000000e+00> : vector<32x16xf32>
    %66 = tpu.matmul %64, %65, %cst_51 {dimension_numbers = #tpu.dot_dimension_numbers<[1], [0], [0], [1], [0, 0, 1, 1], [], []>} : vector<32x16xbf16>, vector<16x16xbf16>, vector<32x16xf32> -> vector<32x16xf32>
    %67 = vector.extract_strided_slice %66 {offsets = [0, 0], sizes = [32, 8], strides = [1, 1]} : vector<32x16xf32> to vector<32x8xf32>
    %68 = vector.extract_strided_slice %66 {offsets = [0, 8], sizes = [32, 8], strides = [1, 1]} : vector<32x16xf32> to vector<32x8xf32>
    %69 = arith.maximumf %67, %68 : vector<32x8xf32>
    %70 = vector.extract_strided_slice %58 {offsets = [0, 0], sizes = [8, 8], strides = [1, 1]} : vector<8x32xf32> to vector<8x8xf32>
    %71 = arith.truncf %70 : vector<8x8xf32> to vector<8x8xbf16>
    %c0_52 = arith.constant 0 : index
    %c0_53 = arith.constant 0 : index
    %c0_54 = arith.constant 0 : index
    %c0_55 = arith.constant 0 : index
    %72 = vector.load %arg6[%c0_52, %c0_53, %c0_54, %c0_55] : memref<1x4x8x8xbf16, #tpu.memory_space<vmem>>, vector<1x1x8x8xbf16>
    %73 = vector.shape_cast %72 : vector<1x1x8x8xbf16> to vector<8x8xbf16>
    %74 = vector.shape_cast %71 : vector<8x8xbf16> to vector<1x1x8x8xbf16>
    tpu.vector_store %arg6[%c0_52, %c0_53, %c0_54, %c0_55], %74 {strides = array<i32>} : memref<1x4x8x8xbf16, #tpu.memory_space<vmem>>, vector<1x1x8x8xbf16>,
    %75 = vector.extract_strided_slice %69 {offsets = [0, 0], sizes = [8, 8], strides = [1, 1]} : vector<32x8xf32> to vector<8x8xf32>
    %76 = arith.truncf %75 : vector<8x8xf32> to vector<8x8xbf16>
    %c0_56 = arith.constant 0 : index
    %c0_57 = arith.constant 0 : index
    %c0_58 = arith.constant 0 : index
    %c0_59 = arith.constant 0 : index
    %77 = vector.load %arg7[%c0_56, %c0_57, %c0_58, %c0_59] : memref<1x4x8x8xbf16, #tpu.memory_space<vmem>>, vector<1x1x8x8xbf16>
    %78 = vector.shape_cast %77 : vector<1x1x8x8xbf16> to vector<8x8xbf16>
    %79 = vector.shape_cast %76 : vector<8x8xbf16> to vector<1x1x8x8xbf16>
    tpu.vector_store %arg7[%c0_56, %c0_57, %c0_58, %c0_59], %79 {strides = array<i32>} : memref<1x4x8x8xbf16, #tpu.memory_space<vmem>>, vector<1x1x8x8xbf16>,
    %80 = vector.extract_strided_slice %58 {offsets = [0, 8], sizes = [8, 8], strides = [1, 1]} : vector<8x32xf32> to vector<8x8xf32>
    %81 = arith.truncf %80 : vector<8x8xf32> to vector<8x8xbf16>
    %c0_60 = arith.constant 0 : index
    %c1_61 = arith.constant 1 : index
    %c0_62 = arith.constant 0 : index
    %c0_63 = arith.constant 0 : index
    %82 = vector.load %arg6[%c0_60, %c1_61, %c0_62, %c0_63] : memref<1x4x8x8xbf16, #tpu.memory_space<vmem>>, vector<1x1x8x8xbf16>
    %83 = vector.shape_cast %82 : vector<1x1x8x8xbf16> to vector<8x8xbf16>
    %84 = vector.shape_cast %81 : vector<8x8xbf16> to vector<1x1x8x8xbf16>
    tpu.vector_store %arg6[%c0_60, %c1_61, %c0_62, %c0_63], %84 {strides = array<i32>} : memref<1x4x8x8xbf16, #tpu.memory_space<vmem>>, vector<1x1x8x8xbf16>,
    %85 = vector.extract_strided_slice %69 {offsets = [8, 0], sizes = [8, 8], strides = [1, 1]} : vector<32x8xf32> to vector<8x8xf32>
    %86 = arith.truncf %85 : vector<8x8xf32> to vector<8x8xbf16>
    %c0_64 = arith.constant 0 : index
    %c1_65 = arith.constant 1 : index
    %c0_66 = arith.constant 0 : index
    %c0_67 = arith.constant 0 : index
    %87 = vector.load %arg7[%c0_64, %c1_65, %c0_66, %c0_67] : memref<1x4x8x8xbf16, #tpu.memory_space<vmem>>, vector<1x1x8x8xbf16>
    %88 = vector.shape_cast %87 : vector<1x1x8x8xbf16> to vector<8x8xbf16>
    %89 = vector.shape_cast %86 : vector<8x8xbf16> to vector<1x1x8x8xbf16>
    tpu.vector_store %arg7[%c0_64, %c1_65, %c0_66, %c0_67], %89 {strides = array<i32>} : memref<1x4x8x8xbf16, #tpu.memory_space<vmem>>, vector<1x1x8x8xbf16>,
    %90 = vector.extract_strided_slice %58 {offsets = [0, 16], sizes = [8, 8], strides = [1, 1]} : vector<8x32xf32> to vector<8x8xf32>
    %91 = arith.truncf %90 : vector<8x8xf32> to vector<8x8xbf16>
    %c0_68 = arith.constant 0 : index
    %c2_69 = arith.constant 2 : index
    %c0_70 = arith.constant 0 : index
    %c0_71 = arith.constant 0 : index
    %92 = vector.load %arg6[%c0_68, %c2_69, %c0_70, %c0_71] : memref<1x4x8x8xbf16, #tpu.memory_space<vmem>>, vector<1x1x8x8xbf16>
    %93 = vector.shape_cast %92 : vector<1x1x8x8xbf16> to vector<8x8xbf16>
    %94 = vector.shape_cast %91 : vector<8x8xbf16> to vector<1x1x8x8xbf16>
    tpu.vector_store %arg6[%c0_68, %c2_69, %c0_70, %c0_71], %94 {strides = array<i32>} : memref<1x4x8x8xbf16, #tpu.memory_space<vmem>>, vector<1x1x8x8xbf16>,
    %95 = vector.extract_strided_slice %69 {offsets = [16, 0], sizes = [8, 8], strides = [1, 1]} : vector<32x8xf32> to vector<8x8xf32>
    %96 = arith.truncf %95 : vector<8x8xf32> to vector<8x8xbf16>
    %c0_72 = arith.constant 0 : index
    %c2_73 = arith.constant 2 : index
    %c0_74 = arith.constant 0 : index
    %c0_75 = arith.constant 0 : index
    %97 = vector.load %arg7[%c0_72, %c2_73, %c0_74, %c0_75] : memref<1x4x8x8xbf16, #tpu.memory_space<vmem>>, vector<1x1x8x8xbf16>
    %98 = vector.shape_cast %97 : vector<1x1x8x8xbf16> to vector<8x8xbf16>
    %99 = vector.shape_cast %96 : vector<8x8xbf16> to vector<1x1x8x8xbf16>
    tpu.vector_store %arg7[%c0_72, %c2_73, %c0_74, %c0_75], %99 {strides = array<i32>} : memref<1x4x8x8xbf16, #tpu.memory_space<vmem>>, vector<1x1x8x8xbf16>,
    %100 = vector.extract_strided_slice %58 {offsets = [0, 24], sizes = [8, 8], strides = [1, 1]} : vector<8x32xf32> to vector<8x8xf32>
    %101 = arith.truncf %100 : vector<8x8xf32> to vector<8x8xbf16>
    %c0_76 = arith.constant 0 : index
    %c3_77 = arith.constant 3 : index
    %c0_78 = arith.constant 0 : index
    %c0_79 = arith.constant 0 : index
    %102 = vector.load %arg6[%c0_76, %c3_77, %c0_78, %c0_79] : memref<1x4x8x8xbf16, #tpu.memory_space<vmem>>, vector<1x1x8x8xbf16>
    %103 = vector.shape_cast %102 : vector<1x1x8x8xbf16> to vector<8x8xbf16>
    %104 = vector.shape_cast %101 : vector<8x8xbf16> to vector<1x1x8x8xbf16>
    tpu.vector_store %arg6[%c0_76, %c3_77, %c0_78, %c0_79], %104 {strides = array<i32>} : memref<1x4x8x8xbf16, #tpu.memory_space<vmem>>, vector<1x1x8x8xbf16>,
    %105 = vector.extract_strided_slice %69 {offsets = [24, 0], sizes = [8, 8], strides = [1, 1]} : vector<32x8xf32> to vector<8x8xf32>
    %106 = arith.truncf %105 : vector<8x8xf32> to vector<8x8xbf16>
    %c0_80 = arith.constant 0 : index
    %c3_81 = arith.constant 3 : index
    %c0_82 = arith.constant 0 : index
    %c0_83 = arith.constant 0 : index
    %107 = vector.load %arg7[%c0_80, %c3_81, %c0_82, %c0_83] : memref<1x4x8x8xbf16, #tpu.memory_space<vmem>>, vector<1x1x8x8xbf16>
    %108 = vector.shape_cast %107 : vector<1x1x8x8xbf16> to vector<8x8xbf16>
    %109 = vector.shape_cast %106 : vector<8x8xbf16> to vector<1x1x8x8xbf16>
    tpu.vector_store %arg7[%c0_80, %c3_81, %c0_82, %c0_83], %109 {strides = array<i32>} : memref<1x4x8x8xbf16, #tpu.memory_space<vmem>>, vector<1x1x8x8xbf16>,
    return
  }
  func.func @transform_0(%arg0: i32, %arg1: i32) -> (i32, i32, i32) {
    %c0_i32 = arith.constant 0 : i32
    %c0_i32_0 = arith.constant 0 : i32
    return %arg0, %arg1, %c0_i32 : i32, i32, i32
  }
  func.func @transform_1(%arg0: i32, %arg1: i32) -> (i32, i32) {
    %c0_i32 = arith.constant 0 : i32
    %c0_i32_0 = arith.constant 0 : i32
    %c0_i32_1 = arith.constant 0 : i32
    return %c0_i32, %c0_i32_0 : i32, i32
  }
  func.func @transform_2(%arg0: i32, %arg1: i32) -> (i32, i32, i32) {
    %c0_i32 = arith.constant 0 : i32
    %c0_i32_0 = arith.constant 0 : i32
    %c0_i32_1 = arith.constant 0 : i32
    %c0_i32_2 = arith.constant 0 : i32
    return %c0_i32, %c0_i32_0, %c0_i32_1 : i32, i32, i32
  }
  func.func @transform_3(%arg0: i32, %arg1: i32) -> (i32, i32) {
    %c0_i32 = arith.constant 0 : i32
    %c0_i32_0 = arith.constant 0 : i32
    %c0_i32_1 = arith.constant 0 : i32
    return %c0_i32, %c0_i32_0 : i32, i32
  }
  func.func @transform_4(%arg0: i32, %arg1: i32) -> (i32, i32, i32, i32) {
    %c0_i32 = arith.constant 0 : i32
    %c0_i32_0 = arith.constant 0 : i32
    %c0_i32_1 = arith.constant 0 : i32
    return %arg0, %arg1, %c0_i32, %c0_i32_0 : i32, i32, i32, i32
  }
  func.func @transform_5(%arg0: i32, %arg1: i32) -> (i32, i32, i32, i32) {
    %c0_i32 = arith.constant 0 : i32
    %c0_i32_0 = arith.constant 0 : i32
    %c0_i32_1 = arith.constant 0 : i32
    return %arg0, %arg1, %c0_i32, %c0_i32_0 : i32, i32, i32, i32
  }
}

</mosaic_0001>

<bundles_post_ra>
// kernel: tpu_custom_call.1
= control target key start
LH: loop header
LB: loop body
LE: loop exit
PB: predicated region body
PF: predicated region fallthrough
CT: control target
= control target key end

     0   :  { %11 = vsyncpa [#allocation4], 0  ;;  %s1966_s0 = inlined_call_operand.hbm [shape: f32[2,64,16], index: 0, kind: input, shape index: {}]   ;;  %s1967_s1 = inlined_call_operand.hbm [shape: bf16[16,32], index: 1, kind: input, shape index: {}]   ;;  %s1968_s2 = inlined_call_operand.hbm [shape: bf16[4,8,16], index: 2, kind: input, shape index: {}]   ;;  %s1969_s3 = inlined_call_operand.hbm [shape: bf16[16,16], index: 3, kind: input, shape index: {}]   ;;  %s1970_s4 = inlined_call_operand.hbm [shape: bf16[2,4,8,8], index: 4, kind: output, shape index: {0}]   ;;  %s1971_s5 = inlined_call_operand.hbm [shape: bf16[2,4,8,8], index: 5, kind: output, shape index: {1}]  }
   0x1   :  { %13 = vsyncpa [#allocation4 + $0x1], 0 }
   0x2   :  { %14 = vsyncpa [#allocation7], 0 }
   0x3   :  { %15 = vsyncpa [#allocation10], 0 }
   0x4   :  { %16 = vsyncpa [#allocation5], 0 }
   0x5   :  { %18 = vsyncpa [#allocation5 + $0x1], 0 }
   0x6   :  { %19 = vsyncpa [#allocation13], 0 }
   0x7   :  { %21 = vsyncpa [#allocation13 + $0x1], 0  ;;  %s1574_s18 = smov 0   ;;  %s1576_s19 = smov 0  }
   0x8   :  { %s1578_s20 = smov 0   ;;  %s1580_s21 = smov 0  }
   0x9   :  { %s1582_s22 = smov 0   ;;  %s1584_s23 = smov 0  }
   0xa LB: > { %1978 = sst [smem:[#allocation19_spill]] %s1494_s18  ;;  %s1023_s24 = sadd.s32 4294967295, %s1514_s23   ;;  %s1514_s23 = sphi %s1584_s23, %s27_s23   ;;  %s1510_s22 = sphi %s1582_s22, %s2001_s22   ;;  %s1506_s21 = sphi %s1580_s21, %s2000_s21   ;;  %s1502_s20 = sphi %s1578_s20, %s1999_s20   ;;  %s1498_s19 = sphi %s1576_s19, %s1998_s19   ;;  %s1494_s18 = sphi %s1574_s18, %s1997_s18  }
   0xb   : > { %s1024_s25 = sadd.s32 4294967294, %s1514_s23   ;;  %p61_p0 = scmp.ne.s32.totalorder %s1498_s19, %s1494_s18 }
   0xc   : > { %p1608_p1 = scmp.eq.s32.totalorder %s1023_s24, 0  ;;  %p1612_p2 = scmp.eq.s32.totalorder %s1023_s24, 1 }
   0xd   : > { %p156_p3 = scmp.eq.s32.totalorder %s1024_s25, 1  ;;  %p1025_p5 = scmp.ge.s32.totalorder %s1514_s23, 1 }
   0xe   : > { %s1979_s26 = scalar_select %p1608_p1, 1, 0 }
   0xf   : > { %s1980_s27 = scalar_select %p1612_p2, 1, 0 }
  0x10   : > { %p1618_p4 = por %p1608_p1, %p61_p0  ;;  %p1623_p6 = por %p156_p3, %p61_p0 }
  0x11   : > { %p191_p7 = scmp.lt.s32.totalorder %s1514_s23, 3  ;;  %s1516_s6 = smov [#allocation6]  }
  0x12   : > { %s1981_s28 = scalar_select %p1618_p4, 1, 0 }
  0x13   : > { %s1982_s29 = scalar_select %p1623_p6, 1, 0 }
  0x14   : > { %p1628_p8 = pnand %p1025_p5, %p191_p7  ;;  %s203_s7 = sshll.u32 %s1516_s6, 4  ;;  %s1632_s7 = int_to_ptr.vmem [resolvable:$true] %s203_s7 }
  0x15   : > { %1983 = sst [smem:[#allocation20_spill]] %s1982_s29  ;;  %s1517_s9 = smov [#allocation8]  }
  0x16   : > { %s1984_s30 = scalar_select %p1628_p8, 1, 0 }
  0x17   : > { %p1164_p9 = pneg %p1628_p8  ;;  %s216_s10 = sshll.u32 %s1517_s9, 4  ;;  %s1643_s10 = int_to_ptr.vmem [resolvable:$true] %s216_s10 }
  0x18   : > { %s1518_s11 = smov [#allocation9]   ;;  %s1278_s15 = scalar_lea.hbm %s1967_s1, 128 }
  0x19   : > { %p1639_p11 = pnand %p1164_p9, %p1608_p1  ;;  %s1645_s12 = sshll.u32 %s1518_s11, 4  ;;  %s230_s12 = int_to_ptr.vmem [resolvable:$true] %s1645_s12 }
  0x1a   : > { %p1279_p12 = scmp.ne.s32.totalorder %s1967_s1, %s1278_s15  ;;  %p1285_p5 = scmp.lt.u32.totalorder %s1278_s15, %s1967_s1 }
  0x1b   : > { %p1655_p13 = pneg %p1639_p11 }
  0x1d   : > { %p1281_p0 = pnand %p1655_p13, %p1279_p12 }
  0x1f   : > { %p1282_p3 = pneg %p1281_p0 }
  0x21   : > { %p1287_p7 = pnand %p1285_p5, %p1282_p3 }
  0x23   : > { %1290 = shalt.err (!%p1287_p7)
}
  0x24   : > { %s1291_s9 = scalar_lea.vmem %s1632_s7, 128  ;;  %p1299_p1 = scmp.lt.s32.totalorder %s1632_s7, %s1632_s7 }
  0x25   : > { %p1292_p9 = scmp.ne.s32.totalorder %s1632_s7, %s1291_s9  ;;  %p1300_p4 = scmp.lt.s32.totalorder %s1291_s9, %s1291_s9 }
  0x27   : > { %p1294_p10 = pnand %p1292_p9, %p1655_p13  ;;  %p1301_p12 = por %p1300_p4, %p1299_p1 }
  0x29   : > { %p1295_p6 = pneg %p1294_p10 }
  0x2b   : > { %p1302_p0 = pnand %p1301_p12, %p1295_p6 }
  0x2d   : > { %1305 = shalt.err (!%p1302_p0)
}
  0x2e   : > { %s1519_s11 = smov 64   ;;  %s1520_s13 = smov 4  }
  0x2f   : > { %1167 = dma.hbm_to_vmem [thread:$0]  (!%p1639_p11), %s1967_s1, 128, %s1632_s7, [#allocation7], %s1519_s11, %s1519_s11, %s1520_s13  }
  0x30   : > { %s1306_s25 = scalar_lea.hbm %s1968_s2, 256 }
  0x31   : > { %p1307_p1 = scmp.ne.s32.totalorder %s1968_s2, %s1306_s25  ;;  %p1313_p10 = scmp.lt.u32.totalorder %s1306_s25, %s1968_s2 }
  0x33   : > { %p1309_p4 = pnand %p1307_p1, %p1655_p13 }
  0x35   : > { %p1310_p6 = pneg %p1309_p4 }
  0x37   : > { %p1315_p3 = pnand %p1313_p10, %p1310_p6 }
  0x39   : > { %1318 = shalt.err (!%p1315_p3)
}
  0x3a   : > { %s1319_s7 = scalar_lea.vmem %s1643_s10, 256  ;;  %p1327_p12 = scmp.lt.s32.totalorder %s1643_s10, %s1643_s10 }
  0x3b   : > { %p1320_p5 = scmp.ne.s32.totalorder %s1643_s10, %s1319_s7  ;;  %p1328_p0 = scmp.lt.s32.totalorder %s1319_s7, %s1319_s7 }
  0x3d   : > { %p1322_p7 = pnand %p1320_p5, %p1655_p13  ;;  %p1329_p1 = por %p1328_p0, %p1327_p12 }
  0x3f   : > { %p1323_p9 = pneg %p1322_p7 }
  0x41   : > { %p1330_p4 = pnand %p1329_p1, %p1323_p9 }
  0x43   : > { %1333 = shalt.err (!%p1330_p4)
}
  0x44   : > { %1170 = dma.hbm_to_vmem [thread:$0]  (!%p1639_p11), %s1968_s2, 256, %s1643_s10, [#allocation7], %s1519_s11, %s1519_s11, %s1520_s13  }
  0x45   : > { %s1334_s16 = scalar_lea.hbm %s1969_s3, 128 }
  0x46   : > { %p1335_p6 = scmp.ne.s32.totalorder %s1969_s3, %s1334_s16  ;;  %p1341_p5 = scmp.lt.u32.totalorder %s1334_s16, %s1969_s3 }
  0x48   : > { %p1337_p10 = pnand %p1335_p6, %p1655_p13 }
  0x4a   : > { %p1338_p3 = pneg %p1337_p10 }
  0x4c   : > { %p1343_p7 = pnand %p1341_p5, %p1338_p3 }
  0x4e   : > { %1346 = shalt.err (!%p1343_p7)
}
  0x4f   : > { %s1347_s7 = scalar_lea.vmem %s230_s12, 128  ;;  %p1355_p1 = scmp.lt.s32.totalorder %s230_s12, %s230_s12 }
  0x50   : > { %p1348_p9 = scmp.ne.s32.totalorder %s230_s12, %s1347_s7  ;;  %p1356_p4 = scmp.lt.s32.totalorder %s1347_s7, %s1347_s7 }
  0x52   : > { %p1350_p12 = pnand %p1348_p9, %p1655_p13  ;;  %p1357_p8 = por %p1356_p4, %p1355_p1 }
  0x54   : > { %p1351_p0 = pneg %p1350_p12 }
  0x56   : > { %p1358_p2 = pnand %p1357_p8, %p1351_p0 }
  0x58   : > { %1361 = shalt.err (!%p1358_p2)
}
  0x59   : > { %1173 = dma.hbm_to_vmem [thread:$0]  (!%p1639_p11), %s1969_s3, 128, %s230_s12, [#allocation10], %s1519_s11, %s1519_s11, %s1520_s13  }
  0x5a   : > { %s48_s24 = sadd.s32 1, %s1502_s20  ;;  %s39_s8 = sadd.s32 1, %s1510_s22 }
  0x5b   : > { %p55_p2 = scmp.ne.s32.totalorder %s1502_s20, %s1498_s19  ;;  %p41_p8 = scmp.ge.s32.totalorder %s39_s8, 2 }
  0x5c   : > { %p56_p13 = scmp.eq.s32.totalorder %s1514_s23, 0  ;;  %p1987_p6 = scmp.ne.s32.totalorder %s1980_s27, 0 }
  0x5d   : > { %p1188_p3 = scmp.lt.s32.totalorder %s1514_s23, 2  ;;  %s2003_s8 = smov (%p41_p8, %s39_s8), 0 }
  0x5e   : > { %p1734_p10 = por %p1987_p6, %p55_p2  ;;  %p57_p5 = por %p56_p13, %p55_p2 }
  0x5f   : > { %s243_s14 = sand.u32 1, %s1502_s20   ;;  %s43_s15 = ssub.s32 %s1510_s22, %s2003_s8 }
  0x60   : > { %p46_p7 = scmp.eq.s32.totalorder %s43_s15, 0  ;;  %s1030_s12 = sshll.u32 %s243_s14, 6 }
  0x61   : > { %s1074_s11 = sshll.u32 %s1510_s22, 10  ;;  %s247_s25 = scalar_lea.vmem [#allocation3], %s1030_s12 }
  0x62   : > { %s1746_s13 = scalar_select %p46_p7, %s1502_s20, %s48_s24  }
  0x63   : > { %s1751_s27 = scalar_lea.hbm %s1966_s0, %s1074_s11  ;;  %s256_s6 = sshll.u32 %s247_s25, 4  ;;  %s1753_s6 = int_to_ptr.vmem [resolvable:$true] %s256_s6 }
  0x64   : > { %p1757_p11 = pnand %p1188_p3, %p57_p5  ;;  %s1761_s7 = scalar_lea.sflag [#allocation4], %s243_s14 }
  0x65   : > { %s1362_s10 = scalar_lea.hbm %s1751_s27, 1024  ;;  %s1367_s15 = scalar_lea.hbm %s1966_s0, 2048 }
  0x66   : > { %p1363_p9 = scmp.ne.s32.totalorder %s1751_s27, %s1362_s10  ;;  %p1364_p12 = pneg %p1757_p11 }
  0x67   : > { %p1368_p4 = scmp.lt.u32.totalorder %s1751_s27, %s1966_s0  ;;  %p1369_p2 = scmp.lt.u32.totalorder %s1367_s15, %s1362_s10 }
  0x68   : > { %p1365_p0 = pnand %p1364_p12, %p1363_p9  ;;  %p1371_p13 = scmp.lt.u32.totalorder %s1362_s10, %s1751_s27 }
  0x69   : > { %p1370_p8 = por %p1369_p2, %p1368_p4 }
  0x6a   : > { %p1366_p1 = pneg %p1365_p0 }
  0x6b   : > { %p1372_p6 = por %p1371_p13, %p1370_p8 }
  0x6d   : > { %p1373_p3 = pnand %p1372_p6, %p1366_p1 }
  0x6f   : > { %1376 = shalt.err (!%p1373_p3)
}
  0x70   : > { %s1377_s14 = scalar_lea.vmem %s1753_s6, 1024  ;;  %s1521_s16 = smov [#allocation3]  }
  0x71   : > { %p1378_p5 = scmp.ne.s32.totalorder %s1753_s6, %s1377_s14  ;;  %s1382_s17 = sshll.u32 %s1521_s16, 4  ;;  %s1383_s17 = int_to_ptr.vmem [resolvable:$false] %s1382_s17 }
  0x72   : > { %s1384_s25 = scalar_lea.vmem %s1383_s17, 2048  ;;  %p1385_p0 = scmp.lt.s32.totalorder %s1753_s6, %s1383_s17 }
  0x73   : > { %p1380_p7 = pnand %p1378_p5, %p1364_p12  ;;  %p1386_p4 = scmp.lt.s32.totalorder %s1384_s25, %s1377_s14 }
  0x75   : > { %p1381_p9 = pneg %p1380_p7  ;;  %p1387_p2 = por %p1386_p4, %p1385_p0 }
  0x77   : > { %p1388_p8 = pnand %p1387_p2, %p1381_p9 }
  0x79   : > { %1391 = shalt.err (!%p1388_p8)
}
  0x7a   : > { %s1522_s10 = smov 128   ;;  %s1523_s18 = smov 8  }
  0x7b   : > { %1177 = dma.hbm_to_vmem [thread:$0]  (!%p1757_p11), %s1751_s27, 1024, %s1753_s6, %s1761_s7, %s1522_s10, %s1522_s10, %s1523_s18  }
  0x7c   : > { %p1990_p12 = scmp.ne.s32.totalorder %s1984_s30, 0 }
  0x7d   : > { %s1792_s24 = sand.u32 (!%p1990_p12), 1, %s1498_s19   ;;  %p1991_p1 = scmp.ne.s32.totalorder (!%p1990_p12), %s1981_s28, 0 }
  0x7e   : > { %268 = sbr.rel (%p1990_p12) target bundleno = 1012 (0x3f4), region = 36  ;;  %s1034_s15 = sshll.u32 (!%p1990_p12), %s1792_s24, 6 }
  0x7f   : > { %s271_s12 = scalar_lea.sflag (!%p1990_p12), [#allocation4], %s1792_s24  ;;  %s1796_s11 = scalar_lea.vmem (!%p1990_p12), [#allocation3], %s1034_s15 }
  0x85   : > { %1473 = dma.done.wait (%p1991_p1), %s271_s12, 1024  }
  0x86   : > { %1475 = vsyncadd (%p1991_p1), %s271_s12, 4294966272  ;;  %p1992_p11 = scmp.ne.s32.totalorder %s1979_s26, 0 }
  0x88   : > { %1477 = dma.done.wait (%p1992_p11), [#allocation7], 384  }
  0x89   : > { %1479 = vsyncadd (%p1992_p11), [#allocation7], 4294966912 }
  0x8a   : > { %1481 = dma.done.wait (%p1992_p11), [#allocation10], 128  }
  0x8b   : > { %1483 = vsyncadd (%p1992_p11), [#allocation10], 4294967168  ;;  %v1276_v0 = vld [vmem:[#allocation6] sm:$0xff]   ;;  %v323_v2 = vld [vmem:[%s1796_s11 + $0x8] sm:$0xff]  ;;  %vm342_vm0 = vcmask 130048   ;;  %vm424_vm1 = vcmask 64512  }
  0x8c   : > { %v322_v1 = vld [vmem:[%s1796_s11] sm:$0xff]  ;;  %v324_v3 = vld [vmem:[%s1796_s11 + $0x10] sm:$0xff]  ;;  %1094 = vmatprep.subr.bf16.mxu0 %v1276_v0  ;;  %v325_v5 = vld [vmem:[%s1796_s11 + $0x18] sm:$0xff]  ;;  %s1524_s26 = smov 8   ;;  %s1525_s28 = smov 24   ;;  %v1536_v31 = vmov 0.0  }
  0x8d   : > { %v330_v4 = vpack.c.bf16 %v323_v2, %v322_v1  ;;  %v326_v6 = vld [vmem:[%s1796_s11 + $0x20] sm:$0xff]  ;;  %v327_v7 = vld [vmem:[%s1796_s11 + $0x28] sm:$0xff]  ;;  %1095 = vmatpush3.bf16.msra.mxu0 %v1276_v0  ;;  %v331_v8 = vpack.c.bf16 %v325_v5, %v324_v3  ;;  %v328_v10 = vld [vmem:[%s1796_s11 + $0x30] sm:$0xff]  ;;  %s1526_s30 = smov 32   ;;  %s1527_s27 = smov 48   ;;  %1104 = vmatprep.subr.bf16.mxu1 %v1536_v31  ;;  %vm430_vm2 = vcmask 130112  }
  0x8e   : > { %v332_v9 = vpack.c.bf16 %v327_v7, %v326_v6  ;;  %v329_v11 = vld [vmem:[%s1796_s11 + $0x38] sm:$0xff]  ;;  %s1528_s6 = smov 16   ;;  %s1529_s9 = smov 72   ;;  %v697_v26 = vld [vmem:[%s1796_s11] ss:$2 sm:$0xff]  ;;  %vm436_vm3 = vcmask 195712  }
  0x8f   : > { %1096 = vmatprep.mubr.msk.bf16.mxu0 %vm342_vm0, %v330_v4  ;;  %v333_v12 = vpack.c.bf16 %v329_v11, %v328_v10  ;;  %s1530_s7 = smov 56   ;;  %s1531_s14 = smov 40   ;;  %v1277_v25 = vld [vmem:[#allocation9] sm:$0xff]   ;;  %v1052_v28 = vld [vmem:[%s1796_s11 + $0x1] ss:$2 sm:$0xff]  ;;  %vm442_vm4 = vcmask 261312  }
  0x90   : > { %1097 = vmatmul.mubr.msk.bf16.vlgmr.msra.gmra.mrb[0].mxu0 %vm342_vm0, %v331_v8  ;;  %s1532_s16 = smov 64   ;;  %s1533_s17 = smov 80   ;;  %v1049_v27 = vld [vmem:[%s1796_s11 + $0x10] ss:$2 sm:$0xff]  ;;  %v1053_v29 = vld [vmem:[%s1796_s11 + $0x11] ss:$2 sm:$0xff]  ;;  %1128 = vmatprep.subr.bf16.mxu0 %v1277_v25  ;;  %v712_v32 = vmax.f32 %v697_v26, %v1052_v28 }
  0x91   : > { %1100 = vmatprep.mubr.msk.bf16.mxu0 %vm342_vm0, %v332_v9  ;;  %s1534_s25 = smov 88   ;;  %s1535_s10 = smov 96   ;;  %v1050_v30 = vld [vmem:[%s1796_s11 + $0x20] ss:$2 sm:$0xff]  ;;  %v713_v33 = vmax.f32 %v1049_v27, %v1053_v29  ;;  %v1051_v34 = vld [vmem:[%s1796_s11 + $0x30] ss:$2 sm:$0xff]  ;;  %1129 = vmatpush3.bf16.msra.mxu0 %v1277_v25 }
  0x92   : > { %v1054_v35 = vld [vmem:[%s1796_s11 + $0x21] ss:$2 sm:$0xff]  ;;  %v1055_v36 = vld [vmem:[%s1796_s11 + $0x31] ss:$2 sm:$0xff]  ;;  %vm448_vm5 = vcmask 326912   ;;  %vm453_vm6 = vcmask 392512  }
  0x93   : > { %v714_v37 = vmax.f32 %v1050_v30, %v1054_v35  ;;  %v715_v38 = vmax.f32 %v1051_v34, %v1055_v36  ;;  %v716_v39 = vpack.c.bf16 %v713_v33, %v712_v32  ;;  %vm458_vm7 = vcmask 458112   ;;  %s1538_s18 = smov 120   ;;  %v508_v0 = vld [vmem:[#allocation8 + $0x4] sm:$0xf]  ;;  %v505_v1 = vld [vmem:[#allocation8] sm:$0xf] }
  0x94   : > { %vm463_vm8 = vcmask 523712   ;;  %vm468_vm9 = vcmask 589312   ;;  %vm473_vm10 = vcmask 654912   ;;  %vm478_vm11 = vcmask 720512   ;;  %v600_v3 = vld [vmem:[#allocation8 + $0x8] sm:$0xf] }
  0x95   : > { %v717_v40 = vpack.c.bf16 %v715_v38, %v714_v37  ;;  %vm483_vm12 = vcmask 786112   ;;  %vm488_vm13 = vcmask 851712   ;;  %vm493_vm14 = vcmask 917312   ;;  %v649_v5 = vld [vmem:[#allocation8 + $0xc] sm:$0xf]  ;;  %s1038_s15 = sshll.u32 %s1792_s24, 4 }
  0x96   : > { %vm498_vm15 = vcmask 982912   ;;  %s317_s12 = scalar_lea.vmem [#allocation12], %s1038_s15 }
  0x97   : > { %s872_s11 = sshll.u32 %s317_s12, 4  ;;  %s1863_s11 = int_to_ptr.vmem [resolvable:$true] %s872_s11 }
  0x98   : > { %1101 = vmatmul.mubr.msk.bf16.gmra.mrb[4].mxu0 %vm342_vm0, %v333_v12 }
  0x99   : > { %1130 = vmatprep.mubr.msk.bf16.mxu0 %vm342_vm0, %v716_v39 }
  0xa0   : > { %1131 = vmatmul.mubr.msk.bf16.vlgmr.msra.gmra.mrb[8].mxu0 %vm342_vm0, %v717_v40 }
 0x163   : > { %v1098_v13 = vpop.f32.mrb[0].mxu0 }
 0x164   : > { %v389_v14 = vpop.f32.mrb[1].mxu0 }
 0x165   : > { %v1099_v15 = vpop.f32.mrb[2].mxu0 }
 0x166   : > { %v421_v16 = vpack.c.bf16 %v1099_v15, %v1098_v13  ;;  %v392_v17 = vpop.f32.mrb[3].mxu0 }
 0x167   : > { %v420_v18 = vpack.c.bf16 %v392_v17, %v389_v14 }
 0x168   : > { %427 = vrot.lane.b32.xlu0 %v421_v16, %s1524_s26  ;;  %s1076_s26 = sshll.u32 %s1506_s21, 8 }
 0x169   : > { %445 = vrot.lane.b32.xlu1 %v420_v18, %s1525_s28  ;;  %425 = vst.msk [vmem:[#allocation2] sm:$0xff] %vm424_vm1, %v420_v18  ;;  %vm1537_vm1 = vmmov 0  }
 0x16a   : > { %1106 = vmatprep.mubr.msk.bf16.mxu1 %vm1537_vm1, %v1536_v31 }
 0x16b   : > { %v1102_v19 = vpop.f32.mrb[4].mxu0 }
 0x16c   : > { %450 = vrot.lane.b32.xlu0 %v421_v16, %s1526_s30  ;;  %v405_v20 = vpop.f32.mrb[5].mxu0 }
 0x16d   : > { %465 = vrot.lane.b32.xlu1 %v420_v18, %s1527_s27  ;;  %v1103_v21 = vpop.f32.mrb[6].mxu0 }
 0x16e   : > { %v423_v22 = vpack.c.bf16 %v1103_v21, %v1102_v19  ;;  %v408_v23 = vpop.f32.mrb[7].mxu0 }
 0x16f   : > { %v422_v24 = vpack.c.bf16 %v408_v23, %v405_v20 }
 0x170   : > { %460 = vrot.lane.b32.xlu0 %v423_v22, %s1527_s27  ;;  %s1871_s27 = scalar_lea.hbm %s1971_s5, %s1076_s26 }
 0x171   : > { %439 = vrot.lane.b32.xlu1 %v423_v22, %s1525_s28 }
 0x173   : > { %v1132_v57 = vpop.f32.mrb[8].mxu0 }
 0x174   : > { %433 = vrot.lane.b32.xlu0 %v422_v24, %s1528_s6  ;;  %v766_v58 = vpop.f32.mrb[9].mxu0  ;;  %s839_s6 = scalar_lea.sflag [#allocation13], %s1792_s24 }
 0x175   : > { %485 = vrot.lane.b32.xlu1 %v420_v18, %s1529_s9  ;;  %v1133_v59 = vpop.f32.mrb[10].mxu0 }
 0x176   : > { %v1271_v60 = vpack.i.bf16 %v1133_v59, %v1132_v57  ;;  %v769_v61 = vpop.f32.mrb[11].mxu0 }
 0x177   : > { %v1266_v62 = vpack.i.bf16 %v769_v61, %v766_v58 }
 0x178   : > { %470 = vrot.lane.b32.xlu0 %v421_v16, %s1530_s7  ;;  %s1539_s7 = smov [#allocation12]  }
 0x179   : > { %455 = vrot.lane.b32.xlu1 %v422_v24, %s1531_s14  ;;  %s1396_s14 = sshll.u32 %s1539_s7, 4  ;;  %s1397_s14 = int_to_ptr.vmem [resolvable:$false] %s1396_s14 }
 0x17a   : > { %p1399_p5 = scmp.lt.s32.totalorder %s1863_s11, %s1397_s14 }
 0x17c   : > { %480 = vrot.lane.b32.xlu0 %v423_v22, %s1529_s9  ;;  %s1392_s9 = scalar_lea.vmem %s1863_s11, 256 }
 0x17d   : > { %475 = vrot.lane.b32.xlu1 %v422_v24, %s1532_s16  ;;  %p1393_p13 = scmp.ne.s32.totalorder %s1863_s11, %s1392_s9 }
 0x17f   : > { %p1394_p6 = pnand %p1393_p13, %p1734_p10 }
 0x180   : > { %490 = vrot.lane.b32.xlu0 %v421_v16, %s1533_s17  ;;  %s1398_s17 = scalar_lea.vmem %s1397_s14, 512 }
 0x181   : > { %495 = vrot.lane.b32.xlu1 %v422_v24, %s1534_s25  ;;  %p1395_p3 = pneg %p1394_p6  ;;  %p1400_p7 = scmp.lt.s32.totalorder %s1398_s17, %s1392_s9 }
 0x183   : > { %p1401_p9 = por %p1400_p7, %p1399_p5 }
 0x184   : > { %500 = vrot.lane.b32.xlu0 %v423_v22, %s1535_s10 }
 0x185   : > { %p1402_p0 = pnand %p1401_p9, %p1395_p3 }
 0x1da   : > { %v428_v41 = vpop.permute.xlu0 %427 }
 0x1db   : > { %431 = vst.msk [vmem:[#allocation2] sm:$0xff] %vm430_vm2, %v428_v41  ;;  %v446_v42 = vpop.permute.xlu1 %445  ;;  %vm503_vm2 = vcmask 1048512  }
 0x1de   : > { %v451_v43 = vpop.permute.xlu0 %450 }
 0x1df   : > { %v466_v44 = vpop.permute.xlu1 %465 }
 0x1e2   : > { %v461_v45 = vpop.permute.xlu0 %460 }
 0x1e3   : > { %v440_v46 = vpop.permute.xlu1 %439 }
 0x1e6   : > { %v434_v47 = vpop.permute.xlu0 %433 }
 0x1e7   : > { %437 = vst.msk [vmem:[#allocation2] sm:$0xff] %vm436_vm3, %v434_v47  ;;  %v486_v48 = vpop.permute.xlu1 %485 }
 0x1e8   : > { %443 = vst.msk [vmem:[#allocation2] sm:$0xff] %vm442_vm4, %v440_v46 }
 0x1e9   : > { %449 = vst.msk [vmem:[#allocation2] sm:$0xff] %vm448_vm5, %v446_v42 }
 0x1ea   : > { %v471_v49 = vpop.permute.xlu0 %470  ;;  %454 = vst.msk [vmem:[#allocation2] sm:$0xff] %vm453_vm6, %v451_v43 }
 0x1eb   : > { %v456_v50 = vpop.permute.xlu1 %455 }
 0x1ec   : > { %459 = vst.msk [vmem:[#allocation2] sm:$0xff] %vm458_vm7, %v456_v50 }
 0x1ed   : > { %464 = vst.msk [vmem:[#allocation2] sm:$0xff] %vm463_vm8, %v461_v45 }
 0x1ee   : > { %v481_v51 = vpop.permute.xlu0 %480  ;;  %469 = vst.msk [vmem:[#allocation2] sm:$0xff] %vm468_vm9, %v466_v44 }
 0x1ef   : > { %v476_v52 = vpop.permute.xlu1 %475  ;;  %474 = vst.msk [vmem:[#allocation2] sm:$0xff] %vm473_vm10, %v471_v49 }
 0x1f0   : > { %479 = vst.msk [vmem:[#allocation2] sm:$0xff] %vm478_vm11, %v476_v52 }
 0x1f1   : > { %484 = vst.msk [vmem:[#allocation2] sm:$0xff] %vm483_vm12, %v481_v51 }
 0x1f2   : > { %489 = vst.msk [vmem:[#allocation2] sm:$0xff] %vm488_vm13, %v486_v48  ;;  %v491_v53 = vpop.permute.xlu0 %490 }
 0x1f3   : > { %494 = vst.msk [vmem:[#allocation2] sm:$0xff] %vm493_vm14, %v491_v53  ;;  %v496_v54 = vpop.permute.xlu1 %495 }
 0x1f4   : > { %499 = vst.msk [vmem:[#allocation2] sm:$0xff] %vm498_vm15, %v496_v54 }
 0x1f6   : > { %v501_v55 = vpop.permute.xlu0 %500 }
 0x1f7   : > { %504 = vst.msk [vmem:[#allocation2] sm:$0xff] %vm503_vm2, %v501_v55 }
 0x1fe   : > { %v506_v56 = vld [vmem:[#allocation2] sm:$0xff] }
 0x1ff   : > { %601 = vrot.lane.b32.xlu0 %v506_v56, %s1532_s16  ;;  %510 = vrot.lane.b32.xlu1 %v506_v56, %s1535_s10 }
 0x203   : > { %650 = vrot.lane.b32.xlu1 %v506_v56, %s1526_s30  ;;  %1267 = vrot.lane.b32.xlu0 %v1266_v62, %s1538_s18 }
 0x207   : > { %1272 = vrot.lane.b32.xlu1 %v1271_v60, %s1538_s18 }
 0x271   : > { %v511_v63 = vpop.permute.xlu1 %510  ;;  %v602_v2 = vpop.permute.xlu0 %601 }
 0x272   : > { %1105 = vmatpush3.bf16.msra.mxu1 %v511_v63 }
 0x273   : > { %1110 = vmatprep.subr.bf16.mxu1 %v1536_v31 }
 0x275   : > { %1107 = vmatmul.mubr.msk.bf16.vlgmr.msra.gmra.mrb[0].mxu1 %vm342_vm0, %v508_v0  ;;  %v651_v4 = vpop.permute.xlu1 %650  ;;  %v1268_v6 = vpop.permute.xlu0 %1267 }
 0x276   : > { %1111 = vmatpush3.bf16.msra.mxu1 %v506_v56  ;;  %1112 = vmatprep.mubr.msk.bf16.mxu1 %vm1537_vm1, %v1536_v31  ;;  %v1270_v8 = vunpack.i.h.bf16 %v1268_v6  ;;  %v1269_v9 = vunpack.i.l.bf16 %v1268_v6 }
 0x277   : > { %1116 = vmatprep.subr.bf16.mxu1 %v1536_v31 }
 0x278   : > { %v798_v12 = vmax.f32 %v769_v61, %v1270_v8  ;;  %v797_v13 = vmax.f32 %v766_v58, %v1269_v9 }
 0x279   : > { %v1273_v7 = vpop.permute.xlu1 %1272 }
 0x27a   : > { %v1275_v10 = vunpack.i.h.bf16 %v1273_v7  ;;  %v1274_v11 = vunpack.i.l.bf16 %v1273_v7  ;;  %v814_v16 = vpack.c.bf16 %v798_v12, %v798_v12  ;;  %v804_v17 = vpack.c.bf16 %v797_v13, %v797_v13 }
 0x27c   : > { %v800_v14 = vmax.f32 %v1133_v59, %v1275_v10  ;;  %v799_v15 = vmax.f32 %v1132_v57, %v1274_v11 }
 0x27e   : > { %v830_v18 = vpack.c.bf16 %v800_v14, %v800_v14  ;;  %v822_v19 = vpack.c.bf16 %v799_v15, %v799_v15 }
 0x281   : > { %1113 = vmatmul.mubr.msk.bf16.vlgmr.msra.gmra.mrb[0].mxu1 %vm342_vm0, %v505_v1 }
 0x282   : > { %1117 = vmatpush3.bf16.msra.mxu1 %v602_v2  ;;  %1118 = vmatprep.mubr.msk.bf16.mxu1 %vm1537_vm1, %v1536_v31 }
 0x283   : > { %1122 = vmatprep.subr.bf16.mxu1 %v1536_v31 }
 0x28d   : > { %1119 = vmatmul.mubr.msk.bf16.vlgmr.msra.gmra.mrb[0].mxu1 %vm342_vm0, %v600_v3 }
 0x28e   : > { %1123 = vmatpush3.bf16.msra.mxu1 %v651_v4  ;;  %1124 = vmatprep.mubr.msk.bf16.mxu1 %vm1537_vm1, %v1536_v31 }
 0x299   : > { %1125 = vmatmul.mubr.msk.bf16.vlgmr.msra.gmra.mrb[0].mxu1 %vm342_vm0, %v649_v5  ;;  %vm802_vm0 = vcmask 60416  }
 0x29a   : > { %805 = vst.msk [vmem:[%s317_s12] sm:$0xf] %vm802_vm0, %v804_v17  ;;  %1061 = vst.msk [vmem:[%s317_s12 + $0x4] sm:$0xf] %vm802_vm0, %v814_v16 }
 0x29b   : > { %1063 = vst.msk [vmem:[%s317_s12 + $0x8] sm:$0xf] %vm802_vm0, %v822_v19  ;;  %1065 = vst.msk [vmem:[%s317_s12 + $0xc] sm:$0xf] %vm802_vm0, %v830_v18 }
 0x29c   : > { %1405 = shalt.err (!%p1402_p0)
}
 0x29d   : > { %s1406_s25 = scalar_lea.hbm %s1871_s27, 256  ;;  %s1410_s28 = scalar_lea.hbm %s1971_s5, 512 }
 0x29e   : > { %p1407_p4 = scmp.ne.s32.totalorder %s1871_s27, %s1406_s25  ;;  %p1411_p12 = scmp.lt.u32.totalorder %s1871_s27, %s1971_s5 }
 0x29f   : > { %p1412_p1 = scmp.lt.u32.totalorder %s1410_s28, %s1406_s25  ;;  %p1414_p13 = scmp.lt.u32.totalorder %s1406_s25, %s1871_s27 }
 0x2a0   : > { %p1408_p2 = pnand %p1407_p4, %p1734_p10 }
 0x2a1   : > { %p1413_p11 = por %p1412_p1, %p1411_p12 }
 0x2a2   : > { %p1409_p8 = pneg %p1408_p2 }
 0x2a3   : > { %p1415_p6 = por %p1414_p13, %p1413_p11 }
 0x2a5   : > { %p1416_p3 = pnand %p1415_p6, %p1409_p8 }
 0x2a7   : > { %1419 = shalt.err (!%p1416_p3)
}
 0x2a8   : > { %s1540_s9 = smov 4   ;;  %s310_s14 = scalar_lea.vmem [#allocation11], %s1038_s15 }
 0x2a9   : > { %1161 = dma.vmem_to_hbm [thread:$0]  (%p1734_p10), %s1863_s11, 256, %s1871_s27, %s839_s6, %s1532_s16, %s1532_s16, %s1540_s9  }
 0x2aa   : > { %s1541_s17 = smov 112   ;;  %s1542_s25 = smov 104  }
 0x2ab   : > { %s854_s10 = sshll.u32 %s310_s14, 4  ;;  %s834_s27 = scalar_lea.sflag [#allocation5], %s1792_s24  ;;  %s1906_s10 = int_to_ptr.vmem [resolvable:$true] %s854_s10 }
 0x2ac   : > { %s1420_s6 = scalar_lea.vmem %s1906_s10, 256  ;;  %s1543_s12 = smov [#allocation11]  }
 0x2ad   : > { %p1421_p5 = scmp.ne.s32.totalorder %s1906_s10, %s1420_s6  ;;  %s1424_s28 = sshll.u32 %s1543_s12, 4  ;;  %s1425_s28 = int_to_ptr.vmem [resolvable:$false] %s1424_s28 }
 0x2ae   : > { %s1426_s21 = scalar_lea.vmem %s1425_s28, 512  ;;  %p1427_p0 = scmp.lt.s32.totalorder %s1906_s10, %s1425_s28 }
 0x2af   : > { %p1422_p7 = pnand %p1421_p5, %p1734_p10  ;;  %p1428_p4 = scmp.lt.s32.totalorder %s1426_s21, %s1420_s6 }
 0x2b1   : > { %p1423_p9 = pneg %p1422_p7  ;;  %p1429_p2 = por %p1428_p4, %p1427_p0 }
 0x2b3   : > { %p1430_p8 = pnand %p1429_p2, %p1423_p9 }
 0x36c   : > { %v690_v20 = vpop.f32.mrb[0].mxu1 }
 0x36d   : > { %v801_v21 = vpack.c.bf16 %v690_v20, %v690_v20  ;;  %v1126_v22 = vpop.f32.mrb[1].mxu1 }
 0x36e   : > { %v693_v23 = vpop.f32.mrb[2].mxu1 }
 0x36f   : > { %803 = vst.msk [vmem:[%s310_s14] sm:$0xf] %vm802_vm0, %v801_v21  ;;  %817 = vrot.lane.b32.xlu1 %v801_v21, %s1541_s17  ;;  %809 = vrot.lane.b32.xlu0 %v801_v21, %s1538_s18  ;;  %v1127_v24 = vpop.f32.mrb[3].mxu1  ;;  %s1913_s18 = scalar_lea.hbm %s1970_s4, %s1076_s26 }
 0x373   : > { %825 = vrot.lane.b32.xlu0 %v801_v21, %s1542_s25 }
 0x3e1   : > { %v810_v25 = vpop.permute.xlu0 %809  ;;  %v818_v26 = vpop.permute.xlu1 %817 }
 0x3e2   : > { %1060 = vst.msk [vmem:[%s310_s14 + $0x4] sm:$0xf] %vm802_vm0, %v810_v25  ;;  %1062 = vst.msk [vmem:[%s310_s14 + $0x8] sm:$0xf] %vm802_vm0, %v818_v26 }
 0x3e5   : > { %v826_v27 = vpop.permute.xlu0 %825 }
 0x3e6   : > { %1064 = vst.msk [vmem:[%s310_s14 + $0xc] sm:$0xf] %vm802_vm0, %v826_v27 }
 0x3e7   : > { %1433 = shalt.err (!%p1430_p8)
}
 0x3e8   : > { %s1434_s26 = scalar_lea.hbm %s1913_s18, 256  ;;  %s1438_s14 = scalar_lea.hbm %s1970_s4, 512 }
 0x3e9   : > { %p1435_p12 = scmp.ne.s32.totalorder %s1913_s18, %s1434_s26  ;;  %p1439_p13 = scmp.lt.u32.totalorder %s1913_s18, %s1970_s4 }
 0x3ea   : > { %p1440_p6 = scmp.lt.u32.totalorder %s1438_s14, %s1434_s26  ;;  %p1442_p5 = scmp.lt.u32.totalorder %s1434_s26, %s1913_s18 }
 0x3eb   : > { %p1436_p1 = pnand %p1435_p12, %p1734_p10 }
 0x3ec   : > { %p1441_p3 = por %p1440_p6, %p1439_p13 }
 0x3ed   : > { %p1437_p11 = pneg %p1436_p1 }
 0x3ee   : > { %p1443_p7 = por %p1442_p5, %p1441_p3 }
 0x3f0   : > { %p1444_p9 = pnand %p1443_p7, %p1437_p11 }
 0x3f2   : > { %1447 = shalt.err (!%p1444_p9)
}
 0x3f3   : > { %1160 = dma.vmem_to_hbm [thread:$0]  (%p1734_p10), %s1906_s10, 256, %s1913_s18, %s834_s27, %s1532_s16, %s1532_s16, %s1540_s9  }
 0x3f4 PF: > { %s1993_s15 = sld [smem:[#allocation19_spill]]  ;;  %s1994_s11 = sld [smem:[#allocation20_spill]] }
 0x3f5   : > { %p1996_p4 = scmp.ge.s32.totalorder %s1514_s23, 2 }
 0x3fa   : > { %s887_s6 = sand.u32 1, %s1993_s15   ;;  %p1995_p0 = scmp.ne.s32.totalorder %s1994_s11, 0 }
 0x3fb   : > { %s888_s12 = scalar_lea.sflag [#allocation5], %s887_s6 }
 0x3fc   : > { %p1179_p2 = pnand %p1996_p4, %p1995_p0 }
 0x3fe   : > { %1485 = dma.done.wait (!%p1179_p2), %s888_s12, 256  }
 0x3ff   : > { %1487 = vsyncadd (!%p1179_p2), %s888_s12, 4294967040  ;;  %s897_s29 = scalar_lea.sflag [#allocation13], %s887_s6 }
 0x400   : > { %1489 = dma.done.wait (!%p1179_p2), %s897_s29, 256  }
 0x401   : > { %1491 = vsyncadd (!%p1179_p2), %s897_s29, 4294967040  ;;  %s27_s23 = sadd.s32 1, %s1514_s23   ;;  %s1997_s18 = smov %s1498_s19 }
 0x402   : > { %p24_p8 = scmp.ge.s32.totalorder %s27_s23, 4   ;;  %s1998_s19 = smov %s1502_s20 }
 0x403   : > { %s1999_s20 = smov %s1746_s13  ;;  %s2000_s21 = smov %s1510_s22 }
 0x404   : > { %s2001_s22 = smov %s2003_s8  ;;  %26 = sbr.rel (!%p24_p8) target bundleno = 10 (0xa), region = 126 }
 0x40b   :  { %902 = vsyncpa [#allocation4], 1 }
 0x40c   :  { %904 = vsyncpa [#allocation4 + $0x1], 1 }
 0x40d   :  { %905 = vsyncpa [#allocation7], 1 }
 0x40e   :  { %906 = vsyncpa [#allocation10], 1 }
 0x40f   :  { %907 = vsyncpa [#allocation5], 1 }
 0x410   :  { %909 = vsyncpa [#allocation5 + $0x1], 1 }
 0x411   :  { %910 = vsyncpa [#allocation13], 1 }
 0x412   :  { %912 = vsyncpa [#allocation13 + $0x1], 1 }

</bundles_post_ra>
